<compile_context>
chip_gen: v7x
topology: tpu7x:2x2x1
jax: 0.10.0
libtpu: 0.0.40
codegen_flags: <defaults>
</compile_context>

<pallas_src>
import jax
import jax.numpy as jnp
from jax.experimental import pallas as pl
from jax.experimental.pallas import tpu as pltpu

LANE = 128          # lane width (last dim granularity)
SUBLANE_BF16 = 16   # bf16 sublane packing (second-to-last dim granularity)


def _round_up(x, m):
    return ((x + m - 1) // m) * m


def _pad_to(x, shape):
    return jnp.pad(x, [(0, t - s) for s, t in zip(x.shape, shape)])


def _actor_kernel(lim_ref, obs_ref, w1_ref, b1_ref, w2_ref, b2_ref,
                  w3_ref, b3_ref, out_ref):
    act_limit = lim_ref[0, 0]                       # SMEM scalar

    x = obs_ref[...]                                # (TB, obs_p) bf16

    # Layer 1: Linear (bf16 MXU, f32 acc) + bias + ReLU in f32
    h1 = jnp.dot(x, w1_ref[...], preferred_element_type=jnp.float32) + b1_ref[...]
    h1 = jnp.maximum(h1, 0.0).astype(jnp.bfloat16)

    # Layer 2
    h2 = jnp.dot(h1, w2_ref[...], preferred_element_type=jnp.float32) + b2_ref[...]
    h2 = jnp.maximum(h2, 0.0).astype(jnp.bfloat16)

    # Output layer: Linear + Tanh, scaled by act_limit (lane-dense 128-wide slab)
    a = jnp.dot(h2, w3_ref[...], preferred_element_type=jnp.float32) + b3_ref[...]
    out_ref[...] = (act_limit * jnp.tanh(a)).astype(out_ref.dtype)


def prepare_actor_params(params):
    """One-time prep: pad every feature dim to a multiple of 128 lanes and cast
    matmul weights to bf16 (biases stay f32 for f32 elementwise math)."""
    w1, b1 = params["w1"], params["b1"]
    w2, b2 = params["w2"], params["b2"]
    w3, b3 = params["w3"], params["b3"]
    obs_dim, h1 = w1.shape
    _, h2 = w2.shape
    _, act_dim = w3.shape
    obs_p = _round_up(obs_dim, LANE)
    h1_p = _round_up(h1, LANE)
    h2_p = _round_up(h2, LANE)
    act_p = _round_up(act_dim, LANE)
    return {
        "w1": _pad_to(w1, (obs_p, h1_p)).astype(jnp.bfloat16),
        "b1": _pad_to(b1, (1, h1_p)).astype(jnp.float32),
        "w2": _pad_to(w2, (h1_p, h2_p)).astype(jnp.bfloat16),
        "b2": _pad_to(b2, (1, h2_p)).astype(jnp.float32),
        "w3": _pad_to(w3, (h2_p, act_p)).astype(jnp.bfloat16),
        "b3": _pad_to(b3, (1, act_p)).astype(jnp.float32),
        "obs_dim": obs_dim,
        "act_dim": act_dim,
    }


def mlp_actor_forward(obs, prepared, act_limit, *, tile_b=512):
    """Fused 3-layer MLP actor forward.

    obs:      [B, obs_dim] float32
    prepared: output of prepare_actor_params (padded bf16 weights, f32 biases)
    """
    obs_dim, act_dim = prepared["obs_dim"], prepared["act_dim"]
    w1, b1 = prepared["w1"], prepared["b1"]
    w2, b2 = prepared["w2"], prepared["b2"]
    w3, b3 = prepared["w3"], prepared["b3"]
    obs_p = w1.shape[0]
    act_p = w3.shape[1]

    B = obs.shape[0]
    # Batch tile: multiple of the bf16 sublane packing; small batches = one tile.
    tb = min(tile_b, _round_up(B, SUBLANE_BF16))
    B_pad = _round_up(B, tb)

    # Pad batch + feature dims; cast activations to bf16 for the MXU.
    obs_padded = _pad_to(obs.astype(jnp.bfloat16), (B_pad, obs_p))

    # act_limit as a runtime SMEM scalar -> one compiled kernel for any value.
    act_limit_arr = jnp.full((1, 1), act_limit, jnp.float32)

    const2d = lambda shape: pl.BlockSpec(shape, lambda i: (0, 0))  # VMEM-resident

    out = pl.pallas_call(
        _actor_kernel,
        out_shape=jax.ShapeDtypeStruct((B_pad, act_p), jnp.float32),
        grid=(B_pad // tb,),
        in_specs=[
            pl.BlockSpec(memory_space=pltpu.MemorySpace.SMEM),     # act_limit
            pl.BlockSpec((tb, obs_p), lambda i: (i, 0)),           # obs tile
            const2d(w1.shape), const2d(b1.shape),
            const2d(w2.shape), const2d(b2.shape),
            const2d(w3.shape), const2d(b3.shape),
        ],
        out_specs=pl.BlockSpec((tb, act_p), lambda i: (i, 0)),
        compiler_params=pltpu.CompilerParams(
            dimension_semantics=("parallel",),        # megacore on v7x, no-op on v5e/v6e
            vmem_limit_bytes=32 * 1024 * 1024,        # ample headroom, safe on v7x (64 MiB)
        ),
    )(act_limit_arr, obs_padded, w1, b1, w2, b2, w3, b3)

    return out[:B, :act_dim]


def init_params(key, obs_dim, hidden_sizes, act_dim):
    """Deterministic synthetic init (matches nn.Linear shapes, stored transposed)."""
    sizes = [obs_dim] + list(hidden_sizes) + [act_dim]
    params = {}
    keys = jax.random.split(key, len(sizes) - 1)
    for j in range(len(sizes) - 1):
        fan_in, fan_out = sizes[j], sizes[j + 1]
        bound = 1.0 / jnp.sqrt(fan_in)
        kw, kb = jax.random.split(keys[j])
        params[f"w{j+1}"] = jax.random.uniform(
            kw, (fan_in, fan_out), jnp.float32, -bound, bound)
        params[f"b{j+1}"] = jax.random.uniform(
            kb, (1, fan_out), jnp.float32, -bound, bound)
    return params


def reference_forward_f32(obs, params, act_limit):
    h = jnp.maximum(obs @ params["w1"] + params["b1"], 0.0)
    h = jnp.maximum(h @ params["w2"] + params["b2"], 0.0)
    return act_limit * jnp.tanh(h @ params["w3"] + params["b3"])


def reference_forward_bf16(obs, params, act_limit):
    """Mirrors the kernel's mixed precision (bf16 matmul operands, f32 acc/elementwise)."""
    def dot(x, w):
        return jnp.dot(x.astype(jnp.bfloat16), w.astype(jnp.bfloat16),
                       preferred_element_type=jnp.float32)
    h = jnp.maximum(dot(obs, params["w1"]) + params["b1"], 0.0)
    h = jnp.maximum(dot(h, params["w2"]) + params["b2"], 0.0)
    return act_limit * jnp.tanh(dot(h, params["w3"]) + params["b3"])


if __name__ == "__main__":
    obs_dim, act_dim = 16, 8
    hidden_sizes = (32, 32)
    act_limit = 2.0
    batch = 4

    key = jax.random.PRNGKey(0)
    k_obs, k_params = jax.random.split(key)
    obs = jax.random.normal(k_obs, (batch, obs_dim), jnp.float32)
    params = init_params(k_params, obs_dim, hidden_sizes, act_dim)
    prepared = prepare_actor_params(params)

    out = mlp_actor_forward(obs, prepared, act_limit)
    out = jax.block_until_ready(out)
    assert out.shape == (batch, act_dim)

    # Tight check vs a reference that uses the same bf16-matmul / f32-acc recipe.
    ref_bf16 = reference_forward_bf16(obs, params, act_limit)
    assert jnp.allclose(out, ref_bf16, atol=1e-4, rtol=1e-4), "mismatch vs bf16 reference"

    # Loose sanity check vs the pure-f32 PyTorch-equivalent reference.
    ref_f32 = reference_forward_f32(obs, params, act_limit)
    assert jnp.allclose(out, ref_f32, atol=1e-1, rtol=1e-1), "mismatch vs f32 reference"

    print("KERNEL_OK")
</pallas_src>

<mosaic_0001>
module attributes {stable_mosaic.version = 11 : i64} {
  func.func @_actor_kernel(%arg0: i32, %arg1: memref<1x1xf32, #tpu.memory_space<smem>>, %arg2: memref<16x128xbf16, #tpu.memory_space<vmem>>, %arg3: memref<128x128xbf16, #tpu.memory_space<vmem>>, %arg4: memref<1x128xf32, #tpu.memory_space<vmem>>, %arg5: memref<128x128xbf16, #tpu.memory_space<vmem>>, %arg6: memref<1x128xf32, #tpu.memory_space<vmem>>, %arg7: memref<128x128xbf16, #tpu.memory_space<vmem>>, %arg8: memref<1x128xf32, #tpu.memory_space<vmem>>, %arg9: memref<16x128xf32, #tpu.memory_space<vmem>>) attributes {dimension_semantics = [#tpu.dimension_semantics<parallel>], iteration_bounds = array<i64: 1>, scalar_prefetch = 0 : i64, scratch_operands = 0 : i64, tpu.core_type = #tpu.core_type<tc>, window_params = [{transform_indices = @transform_0, window_bounds = array<i64: 1, 1>}, {transform_indices = @transform_1, window_bounds = array<i64: 16, 128>}, {pipeline_mode = #tpu.pipeline_mode<synchronous>, transform_indices = @transform_2, window_bounds = array<i64: 128, 128>}, {pipeline_mode = #tpu.pipeline_mode<synchronous>, transform_indices = @transform_3, window_bounds = array<i64: 1, 128>}, {pipeline_mode = #tpu.pipeline_mode<synchronous>, transform_indices = @transform_4, window_bounds = array<i64: 128, 128>}, {pipeline_mode = #tpu.pipeline_mode<synchronous>, transform_indices = @transform_5, window_bounds = array<i64: 1, 128>}, {pipeline_mode = #tpu.pipeline_mode<synchronous>, transform_indices = @transform_6, window_bounds = array<i64: 128, 128>}, {pipeline_mode = #tpu.pipeline_mode<synchronous>, transform_indices = @transform_7, window_bounds = array<i64: 1, 128>}, {transform_indices = @transform_8, window_bounds = array<i64: 16, 128>}]} {
    %c0 = arith.constant 0 : index
    %c0_0 = arith.constant 0 : index
    %0 = memref.load %arg1[%c0, %c0_0] : memref<1x1xf32, #tpu.memory_space<smem>>
    %c0_1 = arith.constant 0 : index
    %c0_2 = arith.constant 0 : index
    %1 = vector.load %arg2[%c0_1, %c0_2] : memref<16x128xbf16, #tpu.memory_space<vmem>>, vector<16x128xbf16>
    %c0_3 = arith.constant 0 : index
    %c0_4 = arith.constant 0 : index
    %2 = vector.load %arg3[%c0_3, %c0_4] : memref<128x128xbf16, #tpu.memory_space<vmem>>, vector<128x128xbf16>
    %cst = arith.constant dense<0.000000e+00> : vector<16x128xf32>
    %3 = tpu.matmul %1, %2, %cst {dimension_numbers = #tpu.dot_dimension_numbers<[1], [0], [0], [1], [0, 0, 1, 1], [], []>} : vector<16x128xbf16>, vector<128x128xbf16>, vector<16x128xf32> -> vector<16x128xf32>
    %c0_5 = arith.constant 0 : index
    %c0_6 = arith.constant 0 : index
    %4 = vector.load %arg4[%c0_5, %c0_6] : memref<1x128xf32, #tpu.memory_space<vmem>>, vector<1x128xf32>
    %5 = vector.broadcast %4 : vector<1x128xf32> to vector<16x128xf32>
    %6 = arith.addf %3, %5 : vector<16x128xf32>
    %cst_7 = arith.constant 0.000000e+00 : f32
    %7 = vector.broadcast %cst_7 : f32 to vector<16x128xf32>
    %8 = arith.maximumf %6, %7 : vector<16x128xf32>
    %9 = arith.truncf %8 : vector<16x128xf32> to vector<16x128xbf16>
    %c0_8 = arith.constant 0 : index
    %c0_9 = arith.constant 0 : index
    %10 = vector.load %arg5[%c0_8, %c0_9] : memref<128x128xbf16, #tpu.memory_space<vmem>>, vector<128x128xbf16>
    %cst_10 = arith.constant dense<0.000000e+00> : vector<16x128xf32>
    %11 = tpu.matmul %9, %10, %cst_10 {dimension_numbers = #tpu.dot_dimension_numbers<[1], [0], [0], [1], [0, 0, 1, 1], [], []>} : vector<16x128xbf16>, vector<128x128xbf16>, vector<16x128xf32> -> vector<16x128xf32>
    %c0_11 = arith.constant 0 : index
    %c0_12 = arith.constant 0 : index
    %12 = vector.load %arg6[%c0_11, %c0_12] : memref<1x128xf32, #tpu.memory_space<vmem>>, vector<1x128xf32>
    %13 = vector.broadcast %12 : vector<1x128xf32> to vector<16x128xf32>
    %14 = arith.addf %11, %13 : vector<16x128xf32>
    %cst_13 = arith.constant 0.000000e+00 : f32
    %15 = vector.broadcast %cst_13 : f32 to vector<16x128xf32>
    %16 = arith.maximumf %14, %15 : vector<16x128xf32>
    %17 = arith.truncf %16 : vector<16x128xf32> to vector<16x128xbf16>
    %c0_14 = arith.constant 0 : index
    %c0_15 = arith.constant 0 : index
    %18 = vector.load %arg7[%c0_14, %c0_15] : memref<128x128xbf16, #tpu.memory_space<vmem>>, vector<128x128xbf16>
    %cst_16 = arith.constant dense<0.000000e+00> : vector<16x128xf32>
    %19 = tpu.matmul %17, %18, %cst_16 {dimension_numbers = #tpu.dot_dimension_numbers<[1], [0], [0], [1], [0, 0, 1, 1], [], []>} : vector<16x128xbf16>, vector<128x128xbf16>, vector<16x128xf32> -> vector<16x128xf32>
    %c0_17 = arith.constant 0 : index
    %c0_18 = arith.constant 0 : index
    %20 = vector.load %arg8[%c0_17, %c0_18] : memref<1x128xf32, #tpu.memory_space<vmem>>, vector<1x128xf32>
    %21 = vector.broadcast %20 : vector<1x128xf32> to vector<16x128xf32>
    %22 = arith.addf %19, %21 : vector<16x128xf32>
    %23 = math.tanh %22 : vector<16x128xf32>
    %24 = vector.broadcast %0 : f32 to vector<16x128xf32>
    %25 = arith.mulf %24, %23 : vector<16x128xf32>
    %c0_19 = arith.constant 0 : index
    %c0_20 = arith.constant 0 : index
    %26 = vector.load %arg9[%c0_19, %c0_20] : memref<16x128xf32, #tpu.memory_space<vmem>>, vector<16x128xf32>
    tpu.vector_store %arg9[%c0_19, %c0_20], %25 {strides = array<i32>} : memref<16x128xf32, #tpu.memory_space<vmem>>, vector<16x128xf32>,
    return
  }
  func.func @transform_0(%arg0: i32) -> (i32, i32) {
    %c0_i32 = arith.constant 0 : i32
    %c0_i32_0 = arith.constant 0 : i32
    %c0_i32_1 = arith.constant 0 : i32
    return %c0_i32, %c0_i32_0 : i32, i32
  }
  func.func @transform_1(%arg0: i32) -> (i32, i32) {
    %c0_i32 = arith.constant 0 : i32
    %c0_i32_0 = arith.constant 0 : i32
    return %arg0, %c0_i32 : i32, i32
  }
  func.func @transform_2(%arg0: i32) -> (i32, i32) {
    %c0_i32 = arith.constant 0 : i32
    %c0_i32_0 = arith.constant 0 : i32
    %c0_i32_1 = arith.constant 0 : i32
    return %c0_i32, %c0_i32_0 : i32, i32
  }
  func.func @transform_3(%arg0: i32) -> (i32, i32) {
    %c0_i32 = arith.constant 0 : i32
    %c0_i32_0 = arith.constant 0 : i32
    %c0_i32_1 = arith.constant 0 : i32
    return %c0_i32, %c0_i32_0 : i32, i32
  }
  func.func @transform_4(%arg0: i32) -> (i32, i32) {
    %c0_i32 = arith.constant 0 : i32
    %c0_i32_0 = arith.constant 0 : i32
    %c0_i32_1 = arith.constant 0 : i32
    return %c0_i32, %c0_i32_0 : i32, i32
  }
  func.func @transform_5(%arg0: i32) -> (i32, i32) {
    %c0_i32 = arith.constant 0 : i32
    %c0_i32_0 = arith.constant 0 : i32
    %c0_i32_1 = arith.constant 0 : i32
    return %c0_i32, %c0_i32_0 : i32, i32
  }
  func.func @transform_6(%arg0: i32) -> (i32, i32) {
    %c0_i32 = arith.constant 0 : i32
    %c0_i32_0 = arith.constant 0 : i32
    %c0_i32_1 = arith.constant 0 : i32
    return %c0_i32, %c0_i32_0 : i32, i32
  }
  func.func @transform_7(%arg0: i32) -> (i32, i32) {
    %c0_i32 = arith.constant 0 : i32
    %c0_i32_0 = arith.constant 0 : i32
    %c0_i32_1 = arith.constant 0 : i32
    return %c0_i32, %c0_i32_0 : i32, i32
  }
  func.func @transform_8(%arg0: i32) -> (i32, i32) {
    %c0_i32 = arith.constant 0 : i32
    %c0_i32_0 = arith.constant 0 : i32
    return %arg0, %c0_i32 : i32, i32
  }
}

</mosaic_0001>

<bundles_post_ra>
// kernel: tpu_custom_call.1
= control target key start
LH: loop header
LB: loop body
LE: loop exit
PB: predicated region body
PF: predicated region fallthrough
CT: control target
= control target key end

     0   :  { %14 = vsyncpa [#allocation4], 0  ;;  %s921_s0 = inlined_call_operand.<no memory space> [shape: f32[1,1], index: 0, kind: input, shape index: {}]   ;;  %s922_s1 = inlined_call_operand.hbm [shape: bf16[16,128], index: 1, kind: input, shape index: {}]   ;;  %s923_s2 = inlined_call_operand.hbm [shape: bf16[128,128], index: 2, kind: input, shape index: {}]   ;;  %s924_s3 = inlined_call_operand.vmem [shape: f32[1,128], index: 3, kind: input, shape index: {}]   ;;  %s925_s4 = inlined_call_operand.hbm [shape: bf16[128,128], index: 4, kind: input, shape index: {}]   ;;  %s926_s5 = inlined_call_operand.vmem [shape: f32[1,128], index: 5, kind: input, shape index: {}]   ;;  %s927_s6 = inlined_call_operand.hbm [shape: bf16[128,128], index: 6, kind: input, shape index: {}]   ;;  %s928_s7 = inlined_call_operand.vmem [shape: f32[1,128], index: 7, kind: input, shape index: {}]   ;;  %s929_s8 = inlined_call_operand.hbm [shape: f32[16,128], index: 8, kind: output, shape index: {}]  }
   0x1   :  { %15 = vsyncpa [#allocation7], 0 }
   0x2   :  { %16 = vsyncpa [#allocation10], 0 }
   0x3   :  { %17 = vsyncpa [#allocation5], 0  ;;  %s737_s27 = smov [#allocation6]   ;;  %s738_s29 = smov [#allocation3]  }
   0x4   :  { %s37_s28 = sshll.u32 %s737_s27, 4  ;;  %s25_s30 = sshll.u32 %s738_s29, 4  ;;  %s38_s28 = int_to_ptr.vmem [resolvable:$true] %s37_s28  ;;  %s793_s30 = int_to_ptr.vmem [resolvable:$true] %s25_s30 }
   0x5   :  { %s619_s11 = scalar_lea.hbm %s923_s2, 1024 }
   0x6   :  { %p620_p0 = scmp.ne.s32.totalorder %s923_s2, %s619_s11  ;;  %p623_p1 = scmp.lt.u32.totalorder %s619_s11, %s923_s2 }
   0x8   :  { %p625_p2 = pnand %p623_p1, %p620_p0 }
   0xa   :  { %628 = shalt.err (!%p625_p2)
}
   0xb   :  { %s629_s16 = scalar_lea.vmem %s38_s28, 1024  ;;  %p634_p4 = scmp.lt.s32.totalorder %s38_s28, %s38_s28 }
   0xc   :  { %p630_p3 = scmp.ne.s32.totalorder %s38_s28, %s629_s16  ;;  %p635_p5 = scmp.lt.s32.totalorder %s629_s16, %s629_s16 }
   0xe   :  { %p636_p6 = por %p635_p5, %p634_p4 }
  0x10   :  { %p637_p7 = pnand %p636_p6, %p630_p3 }
  0x12   :  { %640 = shalt.err (!%p637_p7)
}
  0x13   :  { %s739_s17 = smov 64   ;;  %s740_s18 = smov 4  }
  0x14   :  { %43 = dma.hbm_to_vmem [thread:$0]  %s923_s2, 1024, %s38_s28, [#allocation7], %s739_s17, %s739_s17, %s740_s18  }
  0x15   :  { %s641_s23 = scalar_lea.hbm %s922_s1, 128 }
  0x16   :  { %p642_p8 = scmp.ne.s32.totalorder %s922_s1, %s641_s23  ;;  %p645_p9 = scmp.lt.u32.totalorder %s641_s23, %s922_s1 }
  0x18   :  { %p647_p10 = pnand %p645_p9, %p642_p8 }
  0x1a   :  { %650 = shalt.err (!%p647_p10)
}
  0x1b   :  { %s651_s29 = scalar_lea.vmem %s793_s30, 128  ;;  %p656_p12 = scmp.lt.s32.totalorder %s793_s30, %s793_s30 }
  0x1c   :  { %p652_p11 = scmp.ne.s32.totalorder %s793_s30, %s651_s29  ;;  %p657_p13 = scmp.lt.s32.totalorder %s651_s29, %s651_s29 }
  0x1e   :  { %p658_p0 = por %p657_p13, %p656_p12 }
  0x20   :  { %p659_p1 = pnand %p658_p0, %p652_p11 }
  0x22   :  { %662 = shalt.err (!%p659_p1)
}
  0x23   :  { %31 = dma.hbm_to_vmem [thread:$0]  %s922_s1, 128, %s793_s30, [#allocation4], %s739_s17, %s739_s17, %s740_s18  }
  0x24   :  { %s741_s9 = smov [#allocation8]   ;;  %s742_s11 = smov [#allocation9]  }
  0x25   :  { %s51_s10 = sshll.u32 %s741_s9, 4  ;;  %s65_s12 = sshll.u32 %s742_s11, 4  ;;  %s52_s10 = int_to_ptr.vmem [resolvable:$true] %s51_s10  ;;  %s830_s12 = int_to_ptr.vmem [resolvable:$true] %s65_s12 }
  0x26   :  { %s663_s15 = scalar_lea.hbm %s925_s4, 1024 }
  0x27   :  { %p664_p2 = scmp.ne.s32.totalorder %s925_s4, %s663_s15  ;;  %p667_p3 = scmp.lt.u32.totalorder %s663_s15, %s925_s4 }
  0x29   :  { %p669_p4 = pnand %p667_p3, %p664_p2 }
  0x2b   :  { %672 = shalt.err (!%p669_p4)
}
  0x2c   :  { %s673_s1 = scalar_lea.vmem %s52_s10, 1024  ;;  %p678_p6 = scmp.lt.s32.totalorder %s52_s10, %s52_s10 }
  0x2d   :  { %p674_p5 = scmp.ne.s32.totalorder %s52_s10, %s673_s1  ;;  %p679_p7 = scmp.lt.s32.totalorder %s673_s1, %s673_s1 }
  0x2f   :  { %p680_p8 = por %p679_p7, %p678_p6 }
  0x31   :  { %p681_p9 = pnand %p680_p8, %p674_p5 }
  0x33   :  { %684 = shalt.err (!%p681_p9)
}
  0x34   :  { %57 = dma.hbm_to_vmem [thread:$0]  %s925_s4, 1024, %s52_s10, [#allocation7], %s739_s17, %s739_s17, %s740_s18  }
  0x35   :  { %s685_s25 = scalar_lea.hbm %s927_s6, 1024 }
  0x36   :  { %p686_p10 = scmp.ne.s32.totalorder %s927_s6, %s685_s25  ;;  %p689_p11 = scmp.lt.u32.totalorder %s685_s25, %s927_s6 }
  0x38   :  { %p691_p12 = pnand %p689_p11, %p686_p10 }
  0x3a   :  { %694 = shalt.err (!%p691_p12)
}
  0x3b   :  { %s695_s28 = scalar_lea.vmem %s830_s12, 1024  ;;  %p700_p0 = scmp.lt.s32.totalorder %s830_s12, %s830_s12 }
  0x3c   :  { %p696_p13 = scmp.ne.s32.totalorder %s830_s12, %s695_s28  ;;  %p701_p1 = scmp.lt.s32.totalorder %s695_s28, %s695_s28 }
  0x3e   :  { %p702_p2 = por %p701_p1, %p700_p0 }
  0x40   :  { %p703_p3 = pnand %p702_p2, %p696_p13 }
  0x42   :  { %706 = shalt.err (!%p703_p3)
}
  0x43   :  { %71 = dma.hbm_to_vmem [thread:$0]  %s927_s6, 1024, %s830_s12, [#allocation10], %s739_s17, %s739_s17, %s740_s18  }
  0x44   :  { %729 = dma.done.wait [#allocation4], 128  }
  0x45   :  { %730 = vsyncadd [#allocation4], 4294967168 }
  0x46   :  { %731 = dma.done.wait [#allocation7], 2048  }
  0x47   :  { %732 = vsyncadd [#allocation7], 4294965248 }
  0x48   :  { %733 = dma.done.wait [#allocation10], 1024  }
  0x49   :  { %734 = vsyncadd [#allocation10], 4294966272  ;;  %v743_v0 = vmov 0.0   ;;  %vm744_vm0 = vmmov 0   ;;  %v590_v1 = vld [vmem:[#allocation6] sm:$0xff]   ;;  %v591_v2 = vld [vmem:[#allocation6 + $0x8] sm:$0xff]   ;;  %v440_v53 = vstv %s921_s0 }
  0x4a   :  { %519 = vmatprep.subr.bf16.mxu0 %v743_v0  ;;  %535 = vmatprep.mubr.msk.bf16.mxu0 %vm744_vm0, %v743_v0  ;;  %v592_v3 = vld [vmem:[#allocation6 + $0x10] sm:$0xff]   ;;  %v599_v4 = vld [vmem:[#allocation8] sm:$0xff]   ;;  %v593_v5 = vld [vmem:[#allocation6 + $0x18] sm:$0xff]   ;;  %s745_s13 = smov [#allocation11]  }
  0x4b   :  { %539 = vmatprep.subr.bf16.mxu1 %v743_v0  ;;  %555 = vmatprep.mubr.msk.bf16.mxu1 %vm744_vm0, %v743_v0  ;;  %v600_v6 = vld [vmem:[#allocation8 + $0x8] sm:$0xff]   ;;  %v594_v7 = vld [vmem:[#allocation6 + $0x20] sm:$0xff]   ;;  %v601_v8 = vld [vmem:[#allocation8 + $0x10] sm:$0xff]   ;;  %s450_s14 = sshll.u32 %s745_s13, 4  ;;  %s451_s14 = int_to_ptr.vmem [resolvable:$true] %s450_s14 }
  0x4c   :  { %520 = vmatpush3.bf16.msra.mxu0 %v590_v1  ;;  %540 = vmatpush3.bf16.msra.mxu1 %v599_v4  ;;  %v595_v9 = vld [vmem:[#allocation6 + $0x28] sm:$0xff]   ;;  %v602_v10 = vld [vmem:[#allocation8 + $0x18] sm:$0xff]   ;;  %v596_v11 = vld [vmem:[#allocation6 + $0x30] sm:$0xff]   ;;  %p712_p5 = scmp.lt.s32.totalorder %s451_s14, %s451_s14 }
  0x4d   :  { %521 = vmatprep.subr.bf16.mxu0 %v743_v0  ;;  %541 = vmatprep.subr.bf16.mxu1 %v743_v0  ;;  %v603_v12 = vld [vmem:[#allocation8 + $0x20] sm:$0xff]   ;;  %v597_v13 = vld [vmem:[#allocation6 + $0x38] sm:$0xff]   ;;  %v604_v14 = vld [vmem:[#allocation8 + $0x28] sm:$0xff]  }
  0x4e   :  { %v598_v15 = vld [vmem:[#allocation3] sm:$0xff]   ;;  %v605_v16 = vld [vmem:[#allocation8 + $0x30] sm:$0xff]   ;;  %v607_v18 = vld [vmem:[#allocation9] sm:$0xff]  }
  0x4f   :  { %v606_v17 = vld [vmem:[#allocation8 + $0x38] sm:$0xff]   ;;  %v608_v19 = vld [vmem:[#allocation9 + $0x8] sm:$0xff]   ;;  %v609_v20 = vld [vmem:[#allocation9 + $0x10] sm:$0xff]  }
  0x50   :  { %522 = vmatpush3.bf16.msra.mxu0 %v591_v2  ;;  %542 = vmatpush3.bf16.msra.mxu1 %v600_v6  ;;  %v610_v21 = vld [vmem:[#allocation9 + $0x18] sm:$0xff]   ;;  %v611_v22 = vld [vmem:[#allocation9 + $0x20] sm:$0xff]   ;;  %v612_v23 = vld [vmem:[#allocation9 + $0x28] sm:$0xff]  }
  0x51   :  { %523 = vmatprep.subr.bf16.mxu0 %v743_v0  ;;  %543 = vmatprep.subr.bf16.mxu1 %v743_v0  ;;  %v464_v24 = vld [vmem:[%s924_s3] ss:$0 sm:$0xff]  ;;  %v613_v34 = vld [vmem:[#allocation9 + $0x30] sm:$0xff]  }
  0x52   :  { %v614_v35 = vld [vmem:[#allocation9 + $0x38] sm:$0xff]  }
  0x53   :  { %v474_v36 = vld [vmem:[%s926_s5] ss:$0 sm:$0xff] }
  0x54   :  { %524 = vmatpush3.bf16.msra.mxu0 %v592_v3  ;;  %544 = vmatpush3.bf16.msra.mxu1 %v601_v8  ;;  %v483_v46 = vld [vmem:[%s928_s7] ss:$0 sm:$0xff]  ;;  %s707_s7 = scalar_lea.vmem %s451_s14, 256 }
  0x55   :  { %525 = vmatprep.subr.bf16.mxu0 %v743_v0  ;;  %545 = vmatprep.subr.bf16.mxu1 %v743_v0  ;;  %p708_p4 = scmp.ne.s32.totalorder %s451_s14, %s707_s7  ;;  %p713_p6 = scmp.lt.s32.totalorder %s707_s7, %s707_s7 }
  0x57   :  { %p714_p7 = por %p713_p6, %p712_p5 }
  0x58   :  { %526 = vmatpush3.bf16.msra.mxu0 %v593_v5  ;;  %546 = vmatpush3.bf16.msra.mxu1 %v602_v10 }
  0x59   :  { %527 = vmatprep.subr.bf16.mxu0 %v743_v0  ;;  %547 = vmatprep.subr.bf16.mxu1 %v743_v0  ;;  %p715_p8 = pnand %p714_p7, %p708_p4 }
  0x5c   :  { %528 = vmatpush3.bf16.msra.mxu0 %v594_v7  ;;  %548 = vmatpush3.bf16.msra.mxu1 %v603_v12 }
  0x5d   :  { %529 = vmatprep.subr.bf16.mxu0 %v743_v0  ;;  %549 = vmatprep.subr.bf16.mxu1 %v743_v0 }
  0x60   :  { %530 = vmatpush3.bf16.msra.mxu0 %v595_v9  ;;  %550 = vmatpush3.bf16.msra.mxu1 %v604_v14 }
  0x61   :  { %531 = vmatprep.subr.bf16.mxu0 %v743_v0  ;;  %551 = vmatprep.subr.bf16.mxu1 %v743_v0 }
  0x64   :  { %532 = vmatpush3.bf16.msra.mxu0 %v596_v11  ;;  %552 = vmatpush3.bf16.msra.mxu1 %v605_v16 }
  0x65   :  { %533 = vmatprep.subr.bf16.mxu0 %v743_v0  ;;  %553 = vmatprep.subr.bf16.mxu1 %v743_v0 }
  0x68   :  { %534 = vmatpush3.bf16.msra.mxu0 %v597_v13  ;;  %554 = vmatpush3.bf16.msra.mxu1 %v606_v17 }
  0x69   :  { %559 = vmatprep.subr.bf16.mxu0 %v743_v0 }
  0x6b   :  { %536 = vmatmul.mubr.bf16.vlgmr.msra.gmra.mrb[0].mxu0 %v598_v15 }
  0x6c   :  { %575 = vmatprep.mubr.msk.bf16.mxu0 %vm744_vm0, %v743_v0  ;;  %560 = vmatpush3.bf16.msra.mxu0 %v607_v18 }
  0x6d   :  { %561 = vmatprep.subr.bf16.mxu0 %v743_v0 }
  0x70   :  { %562 = vmatpush3.bf16.msra.mxu0 %v608_v19 }
  0x71   :  { %563 = vmatprep.subr.bf16.mxu0 %v743_v0 }
  0x74   :  { %564 = vmatpush3.bf16.msra.mxu0 %v609_v20 }
  0x75   :  { %565 = vmatprep.subr.bf16.mxu0 %v743_v0 }
  0x78   :  { %566 = vmatpush3.bf16.msra.mxu0 %v610_v21 }
  0x79   :  { %567 = vmatprep.subr.bf16.mxu0 %v743_v0 }
  0x7c   :  { %568 = vmatpush3.bf16.msra.mxu0 %v611_v22 }
  0x7d   :  { %569 = vmatprep.subr.bf16.mxu0 %v743_v0 }
  0x80   :  { %570 = vmatpush3.bf16.msra.mxu0 %v612_v23 }
  0x81   :  { %571 = vmatprep.subr.bf16.mxu0 %v743_v0 }
  0x84   :  { %572 = vmatpush3.bf16.msra.mxu0 %v613_v34 }
  0x85   :  { %573 = vmatprep.subr.bf16.mxu0 %v743_v0 }
  0x88   :  { %574 = vmatpush3.bf16.msra.mxu0 %v614_v35 }
 0x13e   :  { %v201_v25 = vpop.f32.mrb[0].mxu0 }
 0x13f   :  { %v202_v26 = vadd.f32 %v464_v24, %v201_v25  ;;  %v537_v27 = vpop.f32.mrb[1].mxu0 }
 0x140   :  { %v204_v28 = vpop.f32.mrb[2].mxu0 }
 0x141   :  { %v205_v29 = vadd.f32 %v464_v24, %v204_v28  ;;  %v538_v30 = vpop.f32.mrb[3].mxu0  ;;  %v208_v31 = vmax.f32 %v202_v26, 0.0 }
 0x143   :  { %v209_v32 = vmax.f32 %v205_v29, 0.0 }
 0x145   :  { %v210_v33 = vpack.c.bf16 %v209_v32, %v208_v31 }
 0x147   :  { %556 = vmatmul.mubr.bf16.vlgmr.msra.gmra.mrb[0].mxu1 %v210_v33 }
 0x21a   :  { %v316_v37 = vpop.f32.mrb[0].mxu1 }
 0x21b   :  { %v317_v38 = vadd.f32 %v474_v36, %v316_v37  ;;  %v557_v39 = vpop.f32.mrb[1].mxu1 }
 0x21c   :  { %v319_v40 = vpop.f32.mrb[2].mxu1 }
 0x21d   :  { %v320_v41 = vadd.f32 %v474_v36, %v319_v40  ;;  %v558_v42 = vpop.f32.mrb[3].mxu1  ;;  %v323_v43 = vmax.f32 %v317_v38, 0.0 }
 0x21f   :  { %v324_v44 = vmax.f32 %v320_v41, 0.0 }
 0x221   :  { %v325_v45 = vpack.c.bf16 %v324_v44, %v323_v43 }
 0x223   :  { %576 = vmatmul.mubr.bf16.vlgmr.msra.gmra.mrb[4].mxu0 %v325_v45 }
 0x2f6   :  { %v431_v47 = vpop.f32.mrb[4].mxu0 }
 0x2f7   :  { %v432_v48 = vadd.f32 %v483_v46, %v431_v47  ;;  %v577_v49 = vpop.f32.mrb[5].mxu0 }
 0x2f8   :  { %v434_v50 = vpop.f32.mrb[6].mxu0 }
 0x2f9   :  { %615 = vtanh.f32 %v432_v48  ;;  %v435_v51 = vadd.f32 %v483_v46, %v434_v50  ;;  %v578_v52 = vpop.f32.mrb[7].mxu0 }
 0x2fb   :  { %617 = vtanh.f32 %v435_v51 }
 0x303   :  { %v616_v54 = vpop.eup %615 }
 0x304   :  { %v441_v55 = vmul.f32 %v616_v54, %v440_v53 }
 0x305   :  { %v618_v56 = vpop.eup %617 }
 0x306   :  { %v442_v57 = vmul.f32 %v618_v56, %v440_v53  ;;  %443 = vst [vmem:[#allocation11] sm:$0xff] %v441_v55 }
 0x308   :  { %444 = vst [vmem:[#allocation11 + $0x8] sm:$0xff] %v442_v57 }
 0x309   :  { %718 = shalt.err (!%p715_p8)
}
 0x30a   :  { %s719_s0 = scalar_lea.hbm %s929_s8, 256 }
 0x30b   :  { %p720_p9 = scmp.ne.s32.totalorder %s929_s8, %s719_s0  ;;  %p723_p10 = scmp.lt.u32.totalorder %s719_s0, %s929_s8 }
 0x30d   :  { %p725_p11 = pnand %p723_p10, %p720_p9 }
 0x30f   :  { %728 = shalt.err (!%p725_p11)
}
 0x310   :  { %s746_s30 = smov 128   ;;  %s747_s22 = smov 8  }
 0x311   :  { %456 = dma.vmem_to_hbm [thread:$0]  %s451_s14, 256, %s929_s8, [#allocation5], %s746_s30, %s746_s30, %s747_s22  }
 0x312   :  { %735 = dma.done.wait [#allocation5], 256  }
 0x313   :  { %736 = vsyncadd [#allocation5], 4294967040 }
 0x314   :  { %460 = vsyncpa [#allocation4], 1 }
 0x315   :  { %461 = vsyncpa [#allocation7], 1 }
 0x316   :  { %462 = vsyncpa [#allocation10], 1 }
 0x317   :  { %463 = vsyncpa [#allocation5], 1 }

</bundles_post_ra>
